<compile_context>
chip_gen: v7x
topology: tpu7x:2x2x1
jax: 0.10.0
libtpu: 0.0.40
codegen_flags: <defaults>
</compile_context>

<pallas_src>
import jax
import jax.numpy as jnp
from jax.experimental import pallas as pl
from jax.experimental.pallas import tpu as pltpu

# ---------------- model dims (small, synthetic) ----------------
B = 8     # batch
D = 128   # item / input dim (lane-aligned)
H = 32    # per-branch encoder hidden dim
Z = 16    # per-branch latent dim


def _ensemble_vae_kernel(beta_ref, x_ref, bgp_ref, bgu_ref,
                         we_ref, be_ref, whead_ref, bhead_ref,
                         wdec_ref, bd_ref, eps_ref, out_ref):
    beta = beta_ref[0]
    x = x_ref[...]                                                        # (B, D)

    # ---- fused encoder: x, bg_pop, bg_unpop through BOTH branch encoders, 1 matmul
    xall = jnp.concatenate([x, bgp_ref[...], bgu_ref[...]], axis=0)       # (3B, D)
    hall = jnp.tanh(jnp.dot(xall, we_ref[...],
                            preferred_element_type=jnp.float32) + be_ref[...])   # (3B, 2H)

    # ---- fused mu/logvar heads (block-placed weights), 1 matmul
    head = jnp.dot(hall, whead_ref[...],
                   preferred_element_type=jnp.float32) + bhead_ref[...]   # (3B, 4Z)
    mu = head[0:B, 0:2 * Z]              # (B, 2Z)  [mu_pop | mu_unpop]
    lv = head[0:B, 2 * Z:4 * Z]          # (B, 2Z)  [lv_pop | lv_unpop]
    mub = head[B:3 * B, 0:2 * Z]         # (2B, 2Z) background encodings

    std = jnp.exp(0.5 * lv)
    var = jnp.exp(lv)
    z = mu + eps_ref[...] * std          # (B, 2Z)  [z_pop | z_unpop]

    # ---- fused decoders (block-diagonal weights), 1 matmul
    logits = jnp.dot(z, wdec_ref[...],
                     preferred_element_type=jnp.float32) + bd_ref[...]    # (B, 2D)

    # ---- multinomial reconstruction error per branch (log_softmax over its D lanes)
    def branch_re(lg):
        m = jnp.max(lg, axis=-1, keepdims=True)
        lse = jnp.log(jnp.sum(jnp.exp(lg - m), axis=-1, keepdims=True)) + m
        return -jnp.mean(jnp.sum((lg - lse) * x, axis=-1, keepdims=True))

    RE = 0.5 * (branch_re(logits[:, 0:D]) + branch_re(logits[:, D:2 * D]))

    # ---- KL: branch average == -0.25 * mean_b sum over BOTH branches' latent dims
    KL = -0.25 * jnp.mean(jnp.sum(1.0 + lv - mu * mu - var, axis=-1, keepdims=True))

    # ---- triplet (contrastive) loss per branch; margin=1, pairwise_distance eps=1e-6
    peps = 1e-6
    dpos = mu - z + peps                                                  # (B, 2Z)

    def branch_cl(lo, hi, mub_b):
        d_p = jnp.sqrt(jnp.sum(dpos[:, lo:hi] ** 2, axis=-1, keepdims=True))
        d_n = jnp.sqrt(jnp.sum((mu[:, lo:hi] - mub_b + peps) ** 2,
                               axis=-1, keepdims=True))
        return jnp.mean(jnp.maximum(d_p - d_n + 1.0, 0.0))

    CL = 0.5 * (branch_cl(0, Z, mub[0:B, 0:Z])
                + branch_cl(Z, 2 * Z, mub[B:2 * B, Z:2 * Z]))

    out_ref[0] = RE + beta * KL + CL
    out_ref[1] = RE
    out_ref[2] = KL


def prepare_fused_params(p_pop, p_unpop):
    """Fused (block-placed) weight matrices, built ONCE per optimizer step.

    Hoisted out of the per-forward hot path: the forward wrapper does no
    packing/stacking at all.
    """
    zHZ = jnp.zeros((H, Z), jnp.float32)
    zZD = jnp.zeros((Z, D), jnp.float32)
    whead = jnp.concatenate([
        jnp.concatenate([p_pop["wmu"], zHZ, p_pop["wlv"], zHZ], axis=1),
        jnp.concatenate([zHZ, p_unpop["wmu"], zHZ, p_unpop["wlv"]], axis=1),
    ], axis=0)                                                            # (2H, 4Z)
    wdec = jnp.concatenate([
        jnp.concatenate([p_pop["wd"], zZD], axis=1),
        jnp.concatenate([zZD, p_unpop["wd"]], axis=1),
    ], axis=0)                                                            # (2Z, 2D)
    return {
        "we": jnp.concatenate([p_pop["we"], p_unpop["we"]], axis=1),      # (D, 2H)
        "be": jnp.concatenate([p_pop["be"], p_unpop["be"]], axis=1),      # (1, 2H)
        "whead": whead,
        "bhead": jnp.concatenate([p_pop["bmu"], p_unpop["bmu"],
                                  p_pop["blv"], p_unpop["blv"]], axis=1), # (1, 4Z)
        "wdec": wdec,
        "bd": jnp.concatenate([p_pop["bd"], p_unpop["bd"]], axis=1),      # (1, 2D)
    }


def train_total_forward(x, bg_popular, bg_unpopular, beta, fused, eps):
    """Forward of `train_total`: returns (loss, RE, KL), each branch-averaged."""
    beta_arr = jnp.asarray(beta, jnp.float32).reshape((1,))
    vmem = pl.BlockSpec(memory_space=pltpu.MemorySpace.VMEM)
    smem = pl.BlockSpec(memory_space=pltpu.MemorySpace.SMEM)
    out = pl.pallas_call(
        _ensemble_vae_kernel,
        out_shape=jax.ShapeDtypeStruct((3,), jnp.float32),
        in_specs=[smem] + [vmem] * 10,
        out_specs=smem,
        cost_estimate=pl.CostEstimate(flops=750_000, transcendentals=5_000,
                                      bytes_accessed=100_000),
    )(beta_arr, x, bg_popular, bg_unpopular,
      fused["we"], fused["be"], fused["whead"], fused["bhead"],
      fused["wdec"], fused["bd"], eps)
    return out[0], out[1], out[2]


def _init_params(key):
    ks = jax.random.split(key, 8)
    s = 0.05
    return {
        "we":  s * jax.random.normal(ks[0], (D, H), jnp.float32),
        "be":  s * jax.random.normal(ks[4], (1, H), jnp.float32),
        "wmu": s * jax.random.normal(ks[1], (H, Z), jnp.float32),
        "bmu": s * jax.random.normal(ks[5], (1, Z), jnp.float32),
        "wlv": s * jax.random.normal(ks[2], (H, Z), jnp.float32),
        "blv": s * jax.random.normal(ks[6], (1, Z), jnp.float32),
        "wd":  s * jax.random.normal(ks[3], (Z, D), jnp.float32),
        "bd":  s * jax.random.normal(ks[7], (1, D), jnp.float32),
    }


if __name__ == "__main__":
    key = jax.random.PRNGKey(0)
    k_x, k_bp, k_bu, k_pp, k_pu, k_e = jax.random.split(key, 6)

    # Implicit-feedback style binary interaction matrices.
    x = (jax.random.uniform(k_x, (B, D)) < 0.15).astype(jnp.float32)
    bg_popular = (jax.random.uniform(k_bp, (B, D)) < 0.30).astype(jnp.float32)
    bg_unpopular = (jax.random.uniform(k_bu, (B, D)) < 0.05).astype(jnp.float32)
    beta = 0.2

    params_pop = _init_params(k_pp)
    params_unpop = _init_params(k_pu)
    # Deterministic reparameterization noise (stands in for torch.randn_like),
    # already laid out as [eps_pop | eps_unpop] so no wrapper-side packing.
    # TODO(synk): training step (backward + optimizer) is out of scope; forward only.
    eps = jax.random.normal(k_e, (B, 2 * Z), jnp.float32)

    # Hoisted: built once per optimizer step, not per forward.
    fused = prepare_fused_params(params_pop, params_unpop)

    fwd = jax.jit(train_total_forward)
    loss, RE, KL = fwd(x, bg_popular, bg_unpopular, beta, fused, eps)
    jax.block_until_ready((loss, RE, KL))

    # Pure-JAX reference (unfused, per-branch) for a sanity check.
    def ref_branch(x, bg, eps_b, beta, p):
        h = jnp.tanh(x @ p["we"] + p["be"])
        mu = h @ p["wmu"] + p["bmu"]
        lv = h @ p["wlv"] + p["blv"]
        z = mu + eps_b * jnp.exp(0.5 * lv)
        logits = z @ p["wd"] + p["bd"]
        logp = jax.nn.log_softmax(logits, axis=-1)
        RE = -jnp.mean(jnp.sum(logp * x, axis=-1))
        KL = -0.5 * jnp.mean(jnp.sum(1 + lv - mu * mu - jnp.exp(lv), axis=-1))
        mub = jnp.tanh(bg @ p["we"] + p["be"]) @ p["wmu"] + p["bmu"]
        dp = jnp.sqrt(jnp.sum((mu - z + 1e-6) ** 2, -1))
        dn = jnp.sqrt(jnp.sum((mu - mub + 1e-6) ** 2, -1))
        cl = jnp.mean(jnp.maximum(dp - dn + 1.0, 0.0))
        return RE + beta * KL + cl, RE, KL

    lp = ref_branch(x, bg_popular, eps[:, :Z], beta, params_pop)
    lu = ref_branch(x, bg_unpopular, eps[:, Z:], beta, params_unpop)
    ref = tuple((a + b) / 2 for a, b in zip(lp, lu))
    for got, want in zip((loss, RE, KL), ref):
        g, w = float(got), float(want)
        assert abs(g - w) < 1e-3 * (1.0 + abs(w)), (g, w)

    print("KERNEL_OK")
</pallas_src>

<mosaic_0001>
module attributes {stable_mosaic.version = 11 : i64} {
  func.func @_ensemble_vae_kernel(%arg0: memref<1xf32, #tpu.memory_space<smem>>, %arg1: memref<8x128xf32, #tpu.memory_space<vmem>>, %arg2: memref<8x128xf32, #tpu.memory_space<vmem>>, %arg3: memref<8x128xf32, #tpu.memory_space<vmem>>, %arg4: memref<128x64xf32, #tpu.memory_space<vmem>>, %arg5: memref<1x64xf32, #tpu.memory_space<vmem>>, %arg6: memref<64x64xf32, #tpu.memory_space<vmem>>, %arg7: memref<1x64xf32, #tpu.memory_space<vmem>>, %arg8: memref<32x256xf32, #tpu.memory_space<vmem>>, %arg9: memref<1x256xf32, #tpu.memory_space<vmem>>, %arg10: memref<8x32xf32, #tpu.memory_space<vmem>>, %arg11: memref<3xf32, #tpu.memory_space<smem>>) attributes {dimension_semantics = [], scalar_prefetch = 0 : i64, scratch_operands = 0 : i64, tpu.core_type = #tpu.core_type<tc>} {
    %c0 = arith.constant 0 : index
    %0 = memref.load %arg0[%c0] : memref<1xf32, #tpu.memory_space<smem>>
    %c0_0 = arith.constant 0 : index
    %c0_1 = arith.constant 0 : index
    %1 = vector.load %arg1[%c0_0, %c0_1] : memref<8x128xf32, #tpu.memory_space<vmem>>, vector<8x128xf32>
    %c0_2 = arith.constant 0 : index
    %c0_3 = arith.constant 0 : index
    %2 = vector.load %arg2[%c0_2, %c0_3] : memref<8x128xf32, #tpu.memory_space<vmem>>, vector<8x128xf32>
    %c0_4 = arith.constant 0 : index
    %c0_5 = arith.constant 0 : index
    %3 = vector.load %arg3[%c0_4, %c0_5] : memref<8x128xf32, #tpu.memory_space<vmem>>, vector<8x128xf32>
    %4 = tpu.concatenate %1, %2, %3 in 0 : vector<8x128xf32>, vector<8x128xf32>, vector<8x128xf32> -> vector<24x128xf32>
    %c0_6 = arith.constant 0 : index
    %c0_7 = arith.constant 0 : index
    %5 = vector.load %arg4[%c0_6, %c0_7] : memref<128x64xf32, #tpu.memory_space<vmem>>, vector<128x64xf32>
    %cst = arith.constant dense<0.000000e+00> : vector<24x64xf32>
    %6 = tpu.matmul %4, %5, %cst {dimension_numbers = #tpu.dot_dimension_numbers<[1], [0], [0], [1], [0, 0, 1, 1], [], []>} : vector<24x128xf32>, vector<128x64xf32>, vector<24x64xf32> -> vector<24x64xf32>
    %c0_8 = arith.constant 0 : index
    %c0_9 = arith.constant 0 : index
    %7 = vector.load %arg5[%c0_8, %c0_9] : memref<1x64xf32, #tpu.memory_space<vmem>>, vector<1x64xf32>
    %8 = vector.broadcast %7 : vector<1x64xf32> to vector<24x64xf32>
    %9 = arith.addf %6, %8 : vector<24x64xf32>
    %10 = math.tanh %9 : vector<24x64xf32>
    %c0_10 = arith.constant 0 : index
    %c0_11 = arith.constant 0 : index
    %11 = vector.load %arg6[%c0_10, %c0_11] : memref<64x64xf32, #tpu.memory_space<vmem>>, vector<64x64xf32>
    %cst_12 = arith.constant dense<0.000000e+00> : vector<24x64xf32>
    %12 = tpu.matmul %10, %11, %cst_12 {dimension_numbers = #tpu.dot_dimension_numbers<[1], [0], [0], [1], [0, 0, 1, 1], [], []>} : vector<24x64xf32>, vector<64x64xf32>, vector<24x64xf32> -> vector<24x64xf32>
    %c0_13 = arith.constant 0 : index
    %c0_14 = arith.constant 0 : index
    %13 = vector.load %arg7[%c0_13, %c0_14] : memref<1x64xf32, #tpu.memory_space<vmem>>, vector<1x64xf32>
    %14 = vector.broadcast %13 : vector<1x64xf32> to vector<24x64xf32>
    %15 = arith.addf %12, %14 : vector<24x64xf32>
    %16 = vector.extract_strided_slice %15 {offsets = [0, 0], sizes = [8, 32], strides = [1, 1]} : vector<24x64xf32> to vector<8x32xf32>
    %17 = vector.extract_strided_slice %15 {offsets = [0, 32], sizes = [8, 32], strides = [1, 1]} : vector<24x64xf32> to vector<8x32xf32>
    %18 = vector.extract_strided_slice %15 {offsets = [8, 0], sizes = [16, 32], strides = [1, 1]} : vector<24x64xf32> to vector<16x32xf32>
    %cst_15 = arith.constant 5.000000e-01 : f32
    %19 = vector.broadcast %cst_15 : f32 to vector<8x32xf32>
    %20 = arith.mulf %19, %17 : vector<8x32xf32>
    %21 = math.exp %20 : vector<8x32xf32>
    %22 = math.exp %17 : vector<8x32xf32>
    %c0_16 = arith.constant 0 : index
    %c0_17 = arith.constant 0 : index
    %23 = vector.load %arg10[%c0_16, %c0_17] : memref<8x32xf32, #tpu.memory_space<vmem>>, vector<8x32xf32>
    %24 = arith.mulf %23, %21 : vector<8x32xf32>
    %25 = arith.addf %16, %24 : vector<8x32xf32>
    %c0_18 = arith.constant 0 : index
    %c0_19 = arith.constant 0 : index
    %26 = vector.load %arg8[%c0_18, %c0_19] : memref<32x256xf32, #tpu.memory_space<vmem>>, vector<32x256xf32>
    %cst_20 = arith.constant dense<0.000000e+00> : vector<8x256xf32>
    %27 = tpu.matmul %25, %26, %cst_20 {dimension_numbers = #tpu.dot_dimension_numbers<[1], [0], [0], [1], [0, 0, 1, 1], [], []>} : vector<8x32xf32>, vector<32x256xf32>, vector<8x256xf32> -> vector<8x256xf32>
    %c0_21 = arith.constant 0 : index
    %c0_22 = arith.constant 0 : index
    %28 = vector.load %arg9[%c0_21, %c0_22] : memref<1x256xf32, #tpu.memory_space<vmem>>, vector<1x256xf32>
    %29 = vector.broadcast %28 : vector<1x256xf32> to vector<8x256xf32>
    %30 = arith.addf %27, %29 : vector<8x256xf32>
    %31 = vector.extract_strided_slice %30 {offsets = [0, 0], sizes = [8, 128], strides = [1, 1]} : vector<8x256xf32> to vector<8x128xf32>
    %cst_23 = arith.constant dense<0xFF800000> : vector<8xf32>
    %32 = vector.multi_reduction <maximumf>, %31, %cst_23 [1] : vector<8x128xf32> to vector<8xf32>
    %33 = vector.shape_cast %32 : vector<8xf32> to vector<8x1xf32>
    %34 = vector.broadcast %33 : vector<8x1xf32> to vector<8x128xf32>
    %35 = arith.subf %31, %34 : vector<8x128xf32>
    %36 = math.exp %35 : vector<8x128xf32>
    %cst_24 = arith.constant dense<0.000000e+00> : vector<8xf32>
    %37 = vector.multi_reduction <add>, %36, %cst_24 [1] : vector<8x128xf32> to vector<8xf32>
    %38 = vector.shape_cast %37 : vector<8xf32> to vector<8x1xf32>
    %39 = math.log %38 : vector<8x1xf32>
    %40 = arith.addf %39, %33 : vector<8x1xf32>
    %41 = vector.broadcast %40 : vector<8x1xf32> to vector<8x128xf32>
    %42 = arith.subf %31, %41 : vector<8x128xf32>
    %43 = arith.mulf %42, %1 : vector<8x128xf32>
    %cst_25 = arith.constant dense<0.000000e+00> : vector<8xf32>
    %44 = vector.multi_reduction <add>, %43, %cst_25 [1] : vector<8x128xf32> to vector<8xf32>
    %45 = vector.shape_cast %44 : vector<8xf32> to vector<8x1xf32>
    %46 = vector.shape_cast %45 : vector<8x1xf32> to vector<1x8x1xf32>
    %cst_26 = arith.constant dense<0.000000e+00> : vector<1xf32>
    %47 = vector.multi_reduction <add>, %46, %cst_26 [1, 2] : vector<1x8x1xf32> to vector<1xf32>
    %48 = vector.shape_cast %47 : vector<1xf32> to vector<1x1x1xf32>
    %49 = vector.extract %48[0, 0, 0] : f32 from vector<1x1x1xf32>
    %cst_27 = arith.constant 8.000000e+00 : f32
    %50 = arith.divf %49, %cst_27 : f32
    %cst_28 = arith.constant 0.000000e+00 : f32
    %51 = arith.subf %cst_28, %50 : f32
    %52 = vector.extract_strided_slice %30 {offsets = [0, 128], sizes = [8, 128], strides = [1, 1]} : vector<8x256xf32> to vector<8x128xf32>
    %cst_29 = arith.constant dense<0xFF800000> : vector<8xf32>
    %53 = vector.multi_reduction <maximumf>, %52, %cst_29 [1] : vector<8x128xf32> to vector<8xf32>
    %54 = vector.shape_cast %53 : vector<8xf32> to vector<8x1xf32>
    %55 = vector.broadcast %54 : vector<8x1xf32> to vector<8x128xf32>
    %56 = arith.subf %52, %55 : vector<8x128xf32>
    %57 = math.exp %56 : vector<8x128xf32>
    %cst_30 = arith.constant dense<0.000000e+00> : vector<8xf32>
    %58 = vector.multi_reduction <add>, %57, %cst_30 [1] : vector<8x128xf32> to vector<8xf32>
    %59 = vector.shape_cast %58 : vector<8xf32> to vector<8x1xf32>
    %60 = math.log %59 : vector<8x1xf32>
    %61 = arith.addf %60, %54 : vector<8x1xf32>
    %62 = vector.broadcast %61 : vector<8x1xf32> to vector<8x128xf32>
    %63 = arith.subf %52, %62 : vector<8x128xf32>
    %64 = arith.mulf %63, %1 : vector<8x128xf32>
    %cst_31 = arith.constant dense<0.000000e+00> : vector<8xf32>
    %65 = vector.multi_reduction <add>, %64, %cst_31 [1] : vector<8x128xf32> to vector<8xf32>
    %66 = vector.shape_cast %65 : vector<8xf32> to vector<8x1xf32>
    %67 = vector.shape_cast %66 : vector<8x1xf32> to vector<1x8x1xf32>
    %cst_32 = arith.constant dense<0.000000e+00> : vector<1xf32>
    %68 = vector.multi_reduction <add>, %67, %cst_32 [1, 2] : vector<1x8x1xf32> to vector<1xf32>
    %69 = vector.shape_cast %68 : vector<1xf32> to vector<1x1x1xf32>
    %70 = vector.extract %69[0, 0, 0] : f32 from vector<1x1x1xf32>
    %cst_33 = arith.constant 8.000000e+00 : f32
    %71 = arith.divf %70, %cst_33 : f32
    %cst_34 = arith.constant 0.000000e+00 : f32
    %72 = arith.subf %cst_34, %71 : f32
    %73 = arith.addf %51, %72 : f32
    %cst_35 = arith.constant 5.000000e-01 : f32
    %74 = arith.mulf %cst_35, %73 : f32
    %cst_36 = arith.constant 1.000000e+00 : f32
    %75 = vector.broadcast %cst_36 : f32 to vector<8x32xf32>
    %76 = arith.addf %75, %17 : vector<8x32xf32>
    %77 = arith.mulf %16, %16 : vector<8x32xf32>
    %78 = arith.subf %76, %77 : vector<8x32xf32>
    %79 = arith.subf %78, %22 : vector<8x32xf32>
    %cst_37 = arith.constant dense<0.000000e+00> : vector<8xf32>
    %80 = vector.multi_reduction <add>, %79, %cst_37 [1] : vector<8x32xf32> to vector<8xf32>
    %81 = vector.shape_cast %80 : vector<8xf32> to vector<8x1xf32>
    %82 = vector.shape_cast %81 : vector<8x1xf32> to vector<1x8x1xf32>
    %cst_38 = arith.constant dense<0.000000e+00> : vector<1xf32>
    %83 = vector.multi_reduction <add>, %82, %cst_38 [1, 2] : vector<1x8x1xf32> to vector<1xf32>
    %84 = vector.shape_cast %83 : vector<1xf32> to vector<1x1x1xf32>
    %85 = vector.extract %84[0, 0, 0] : f32 from vector<1x1x1xf32>
    %cst_39 = arith.constant 8.000000e+00 : f32
    %86 = arith.divf %85, %cst_39 : f32
    %cst_40 = arith.constant -2.500000e-01 : f32
    %87 = arith.mulf %cst_40, %86 : f32
    %88 = arith.subf %16, %25 : vector<8x32xf32>
    %cst_41 = arith.constant 9.99999997E-7 : f32
    %89 = vector.broadcast %cst_41 : f32 to vector<8x32xf32>
    %90 = arith.addf %88, %89 : vector<8x32xf32>
    %91 = vector.extract_strided_slice %18 {offsets = [0, 0], sizes = [8, 16], strides = [1, 1]} : vector<16x32xf32> to vector<8x16xf32>
    %92 = vector.extract_strided_slice %90 {offsets = [0, 0], sizes = [8, 16], strides = [1, 1]} : vector<8x32xf32> to vector<8x16xf32>
    %93 = arith.mulf %92, %92 : vector<8x16xf32>
    %cst_42 = arith.constant dense<0.000000e+00> : vector<8xf32>
    %94 = vector.multi_reduction <add>, %93, %cst_42 [1] : vector<8x16xf32> to vector<8xf32>
    %95 = vector.shape_cast %94 : vector<8xf32> to vector<8x1xf32>
    %96 = math.sqrt %95 : vector<8x1xf32>
    %97 = vector.extract_strided_slice %16 {offsets = [0, 0], sizes = [8, 16], strides = [1, 1]} : vector<8x32xf32> to vector<8x16xf32>
    %98 = arith.subf %97, %91 : vector<8x16xf32>
    %cst_43 = arith.constant 9.99999997E-7 : f32
    %99 = vector.broadcast %cst_43 : f32 to vector<8x16xf32>
    %100 = arith.addf %98, %99 : vector<8x16xf32>
    %101 = arith.mulf %100, %100 : vector<8x16xf32>
    %cst_44 = arith.constant dense<0.000000e+00> : vector<8xf32>
    %102 = vector.multi_reduction <add>, %101, %cst_44 [1] : vector<8x16xf32> to vector<8xf32>
    %103 = vector.shape_cast %102 : vector<8xf32> to vector<8x1xf32>
    %104 = math.sqrt %103 : vector<8x1xf32>
    %105 = arith.subf %96, %104 : vector<8x1xf32>
    %cst_45 = arith.constant 1.000000e+00 : f32
    %106 = vector.broadcast %cst_45 : f32 to vector<8x1xf32>
    %107 = arith.addf %105, %106 : vector<8x1xf32>
    %cst_46 = arith.constant 0.000000e+00 : f32
    %108 = vector.broadcast %cst_46 : f32 to vector<8x1xf32>
    %109 = arith.maximumf %107, %108 : vector<8x1xf32>
    %110 = vector.shape_cast %109 : vector<8x1xf32> to vector<1x8x1xf32>
    %cst_47 = arith.constant dense<0.000000e+00> : vector<1xf32>
    %111 = vector.multi_reduction <add>, %110, %cst_47 [1, 2] : vector<1x8x1xf32> to vector<1xf32>
    %112 = vector.shape_cast %111 : vector<1xf32> to vector<1x1x1xf32>
    %113 = vector.extract %112[0, 0, 0] : f32 from vector<1x1x1xf32>
    %cst_48 = arith.constant 8.000000e+00 : f32
    %114 = arith.divf %113, %cst_48 : f32
    %115 = vector.extract_strided_slice %18 {offsets = [8, 16], sizes = [8, 16], strides = [1, 1]} : vector<16x32xf32> to vector<8x16xf32>
    %116 = vector.extract_strided_slice %90 {offsets = [0, 16], sizes = [8, 16], strides = [1, 1]} : vector<8x32xf32> to vector<8x16xf32>
    %117 = arith.mulf %116, %116 : vector<8x16xf32>
    %cst_49 = arith.constant dense<0.000000e+00> : vector<8xf32>
    %118 = vector.multi_reduction <add>, %117, %cst_49 [1] : vector<8x16xf32> to vector<8xf32>
    %119 = vector.shape_cast %118 : vector<8xf32> to vector<8x1xf32>
    %120 = math.sqrt %119 : vector<8x1xf32>
    %121 = vector.extract_strided_slice %16 {offsets = [0, 16], sizes = [8, 16], strides = [1, 1]} : vector<8x32xf32> to vector<8x16xf32>
    %122 = arith.subf %121, %115 : vector<8x16xf32>
    %cst_50 = arith.constant 9.99999997E-7 : f32
    %123 = vector.broadcast %cst_50 : f32 to vector<8x16xf32>
    %124 = arith.addf %122, %123 : vector<8x16xf32>
    %125 = arith.mulf %124, %124 : vector<8x16xf32>
    %cst_51 = arith.constant dense<0.000000e+00> : vector<8xf32>
    %126 = vector.multi_reduction <add>, %125, %cst_51 [1] : vector<8x16xf32> to vector<8xf32>
    %127 = vector.shape_cast %126 : vector<8xf32> to vector<8x1xf32>
    %128 = math.sqrt %127 : vector<8x1xf32>
    %129 = arith.subf %120, %128 : vector<8x1xf32>
    %cst_52 = arith.constant 1.000000e+00 : f32
    %130 = vector.broadcast %cst_52 : f32 to vector<8x1xf32>
    %131 = arith.addf %129, %130 : vector<8x1xf32>
    %cst_53 = arith.constant 0.000000e+00 : f32
    %132 = vector.broadcast %cst_53 : f32 to vector<8x1xf32>
    %133 = arith.maximumf %131, %132 : vector<8x1xf32>
    %134 = vector.shape_cast %133 : vector<8x1xf32> to vector<1x8x1xf32>
    %cst_54 = arith.constant dense<0.000000e+00> : vector<1xf32>
    %135 = vector.multi_reduction <add>, %134, %cst_54 [1, 2] : vector<1x8x1xf32> to vector<1xf32>
    %136 = vector.shape_cast %135 : vector<1xf32> to vector<1x1x1xf32>
    %137 = vector.extract %136[0, 0, 0] : f32 from vector<1x1x1xf32>
    %cst_55 = arith.constant 8.000000e+00 : f32
    %138 = arith.divf %137, %cst_55 : f32
    %139 = arith.addf %114, %138 : f32
    %cst_56 = arith.constant 5.000000e-01 : f32
    %140 = arith.mulf %cst_56, %139 : f32
    %141 = arith.mulf %0, %87 : f32
    %142 = arith.addf %74, %141 : f32
    %143 = arith.addf %142, %140 : f32
    %c0_57 = arith.constant 0 : index
    %144 = memref.load %arg11[%c0_57] : memref<3xf32, #tpu.memory_space<smem>>
    memref.store %143, %arg11[%c0_57] : memref<3xf32, #tpu.memory_space<smem>>
    %c1 = arith.constant 1 : index
    %145 = memref.load %arg11[%c1] : memref<3xf32, #tpu.memory_space<smem>>
    memref.store %74, %arg11[%c1] : memref<3xf32, #tpu.memory_space<smem>>
    %c2 = arith.constant 2 : index
    %146 = memref.load %arg11[%c2] : memref<3xf32, #tpu.memory_space<smem>>
    memref.store %87, %arg11[%c2] : memref<3xf32, #tpu.memory_space<smem>>
    return
  }
}

</mosaic_0001>

<bundles_post_ra>
// kernel: train_total_forward.1
= control target key start
LH: loop header
LB: loop body
LE: loop exit
PB: predicated region body
PF: predicated region fallthrough
CT: control target
= control target key end

     0   :  { %v769_v3 = vmov 0.0|0.0   ;;  %vm770_vm0 = vmmov 0   ;;  %v771_v6 = vmov 0.0   ;;  %s1019_s0 = inlined_call_operand.<no memory space> [shape: f32[1], index: 0, kind: input, shape index: {}]   ;;  %s1020_s1 = inlined_call_operand.vmem [shape: f32[8,128], index: 1, kind: input, shape index: {}]   ;;  %s1021_s2 = inlined_call_operand.vmem [shape: f32[8,128], index: 2, kind: input, shape index: {}]   ;;  %s1022_s3 = inlined_call_operand.vmem [shape: f32[8,128], index: 3, kind: input, shape index: {}]   ;;  %s1023_s4 = inlined_call_operand.vmem [shape: f32[128,64], index: 4, kind: input, shape index: {}]   ;;  %s1024_s5 = inlined_call_operand.vmem [shape: f32[1,64], index: 5, kind: input, shape index: {}]   ;;  %s1025_s6 = inlined_call_operand.vmem [shape: f32[64,64], index: 6, kind: input, shape index: {}]   ;;  %s1026_s7 = inlined_call_operand.vmem [shape: f32[1,64], index: 7, kind: input, shape index: {}]   ;;  %s1027_s8 = inlined_call_operand.vmem [shape: f32[32,256], index: 8, kind: input, shape index: {}]   ;;  %s1028_s9 = inlined_call_operand.vmem [shape: f32[1,256], index: 9, kind: input, shape index: {}]   ;;  %s1029_s10 = inlined_call_operand.vmem [shape: f32[8,32], index: 10, kind: input, shape index: {}]   ;;  %s1030_s11 = inlined_call_operand.vmem [shape: f32[3], index: 11, kind: output, shape index: {}]  }
   0x1   :  { %v44_v0 = vld [vmem:[%s1023_s4] sm:$0xff]  ;;  %v45_v1 = vld [vmem:[%s1023_s4 + $0x8] sm:$0xff]  ;;  %v46_v2 = vld [vmem:[%s1023_s4 + $0x10] sm:$0xff]  ;;  %668 = vmatprep.subr.bf16.mxu0 %v769_v3  ;;  %634 = vmatprep.mubr.msk.f32.mxu0 %vm770_vm0, %v771_v6 }
   0x2   :  { %v669_v4 = vpack.c.bf16 %v45_v1, %v44_v0  ;;  %v47_v5 = vld [vmem:[%s1023_s4 + $0x18] sm:$0xff]  ;;  %692 = vmatprep.subr.bf16.mxu1 %v769_v3  ;;  %659 = vmatprep.mubr.msk.f32.mxu1 %vm770_vm0, %v771_v6  ;;  %v48_v8 = vld [vmem:[%s1023_s4 + $0x20] sm:$0xff]  ;;  %v49_v9 = vld [vmem:[%s1023_s4 + $0x28] sm:$0xff] }
   0x3   :  { %v672_v7 = vpack.c.bf16 %v47_v5, %v46_v2  ;;  %v150_v10 = vld [vmem:[%s1025_s6] sm:$0xff]  ;;  %v151_v11 = vld [vmem:[%s1025_s6 + $0x8] sm:$0xff]  ;;  %v675_v12 = vpack.c.bf16 %v49_v9, %v48_v8 }
   0x4   :  { %670 = vmatpush3.bf16.msra.mxu0 %v669_v4  ;;  %v693_v13 = vpack.c.bf16 %v151_v11, %v150_v10 }
   0x5   :  { %671 = vmatprep.subr.bf16.mxu0 %v769_v3 }
   0x8   :  { %673 = vmatpush3.bf16.msra.mxu0 %v672_v7 }
   0x9   :  { %17 = vsyncpa [#allocation4], 0  ;;  %674 = vmatprep.subr.bf16.mxu0 %v769_v3  ;;  %v50_v14 = vld [vmem:[%s1023_s4 + $0x30] sm:$0xff]  ;;  %v51_v15 = vld [vmem:[%s1023_s4 + $0x38] sm:$0xff]  ;;  %694 = vmatpush3.bf16.msra.mxu1 %v693_v13  ;;  %vm165_vm1 = vcmask 523264   ;;  %vm287_vm2 = vcmask 261120  }
   0xa   :  { %695 = vmatprep.subr.bf16.mxu1 %v769_v3  ;;  %v678_v16 = vpack.c.bf16 %v51_v15, %v50_v14  ;;  %v52_v17 = vld [vmem:[%s1023_s4 + $0x40] sm:$0xff]  ;;  %v53_v18 = vld [vmem:[%s1023_s4 + $0x48] sm:$0xff]  ;;  %v54_v20 = vld [vmem:[%s1023_s4 + $0x50] sm:$0xff]  ;;  %vm453_vm3 = vcmask 130048   ;;  %vm376_vm5 = vcmask 7168   ;;  %s557_s24 = sshll.u32 %s1030_s11, 4  ;;  %s558_s24 = int_to_ptr.vmem [resolvable:$true] %s557_s24 }
   0xb   :  { %v681_v19 = vpack.c.bf16 %v53_v18, %v52_v17  ;;  %v55_v21 = vld [vmem:[%s1023_s4 + $0x58] sm:$0xff]  ;;  %v56_v23 = vld [vmem:[%s1023_s4 + $0x60] sm:$0xff]  ;;  %v57_v24 = vld [vmem:[%s1023_s4 + $0x68] sm:$0xff]  ;;  %p760_p1 = scmp.lt.s32.totalorder %s558_s24, %s558_s24 }
   0xc   :  { %676 = vmatpush3.bf16.msra.mxu0 %v675_v12  ;;  %v684_v22 = vpack.c.bf16 %v55_v21, %v54_v20  ;;  %v687_v25 = vpack.c.bf16 %v57_v24, %v56_v23  ;;  %v58_v26 = vld [vmem:[%s1023_s4 + $0x70] sm:$0xff]  ;;  %v59_v27 = vld [vmem:[%s1023_s4 + $0x78] sm:$0xff]  ;;  %v907_v29 = vld [vmem:[%s1020_s1] sm:$0xff] }
   0xd   :  { %677 = vmatprep.subr.bf16.mxu0 %v769_v3  ;;  %v690_v28 = vpack.c.bf16 %v59_v27, %v58_v26  ;;  %v42_v30 = vld [vmem:[%s1021_s2] sm:$0xff]  ;;  %v152_v32 = vld [vmem:[%s1025_s6 + $0x10] sm:$0xff]  ;;  %v153_v33 = vld [vmem:[%s1025_s6 + $0x18] sm:$0xff] }
   0xe   :  { %v43_v31 = vld [vmem:[%s1022_s3] sm:$0xff]  ;;  %v696_v34 = vpack.c.bf16 %v153_v33, %v152_v32  ;;  %v155_v36 = vld [vmem:[%s1025_s6 + $0x28] sm:$0xff]  ;;  %v156_v38 = vld [vmem:[%s1025_s6 + $0x30] sm:$0xff]  ;;  %s755_s3 = scalar_lea.vmem %s558_s24, 16 }
   0xf   :  { %v154_v35 = vld [vmem:[%s1025_s6 + $0x20] sm:$0xff]  ;;  %v157_v39 = vld [vmem:[%s1025_s6 + $0x38] sm:$0xff]  ;;  %v268_v54 = vld [vmem:[%s1027_s8 + $0x8] sm:$0xff]  ;;  %p756_p0 = scmp.ne.s32.totalorder %s558_s24, %s755_s3  ;;  %p761_p2 = scmp.lt.s32.totalorder %s755_s3, %s755_s3 }
  0x10   :  { %679 = vmatpush3.bf16.msra.mxu0 %v678_v16  ;;  %697 = vmatpush3.bf16.msra.mxu1 %v696_v34  ;;  %v699_v37 = vpack.c.bf16 %v155_v36, %v154_v35  ;;  %v702_v40 = vpack.c.bf16 %v157_v39, %v156_v38  ;;  %v566_v41 = vld [vmem:[%s1024_s5] ss:$0 sm:$0xff]  ;;  %v270_v55 = vld [vmem:[%s1027_s8 + $0x18] sm:$0xff]  ;;  %v269_v58 = vld [vmem:[%s1027_s8 + $0x10] sm:$0xff] }
  0x11   :  { %680 = vmatprep.subr.bf16.mxu0 %v769_v3  ;;  %698 = vmatprep.subr.bf16.mxu1 %v769_v3  ;;  %v267_v56 = vld [vmem:[%s1027_s8] sm:$0xff]  ;;  %v704_v57 = vpack.c.bf16 %v270_v55, %v268_v54  ;;  %v272_v59 = vld [vmem:[%s1027_s8 + $0x28] sm:$0xff]  ;;  %v274_v60 = vld [vmem:[%s1027_s8 + $0x38] sm:$0xff]  ;;  %p762_p3 = por %p761_p2, %p760_p1 }
  0x12   :  { %v706_v61 = vpack.c.bf16 %v269_v58, %v267_v56  ;;  %v708_v62 = vpack.c.bf16 %v274_v60, %v272_v59  ;;  %v271_v63 = vld [vmem:[%s1027_s8 + $0x20] sm:$0xff]  ;;  %v273_v0 = vld [vmem:[%s1027_s8 + $0x30] sm:$0xff]  ;;  %s772_s8 = smov 96  }
  0x13   :  { %v710_v1 = vpack.c.bf16 %v273_v0, %v271_v63  ;;  %v567_v2 = vld [vmem:[%s1026_s7] ss:$0 sm:$0xff]  ;;  %p763_p4 = pnand %p762_p3, %p756_p0 }
  0x14   :  { %682 = vmatpush3.bf16.msra.mxu0 %v681_v19  ;;  %700 = vmatpush3.bf16.msra.mxu1 %v699_v37  ;;  %v260_v15 = vld [vmem:[%s1029_s10] sm:$0xff]  ;;  %v277_v19 = vlaneseq  ;;  %s773_s10 = smov 32  }
  0x15   :  { %683 = vmatprep.subr.bf16.mxu0 %v769_v3  ;;  %701 = vmatprep.subr.bf16.mxu1 %v769_v3 }
  0x16   :  { %v278_v20 = vshrl.u32 %v277_v19, 7 }
  0x18   :  { %685 = vmatpush3.bf16.msra.mxu0 %v684_v22  ;;  %703 = vmatpush3.bf16.msra.mxu1 %v702_v40  ;;  %v279_v21 = vsub.s32 0, %v278_v20  ;;  %v275_v22 = vld [vmem:[%s1028_s9] sm:$0x3]  ;;  %v283_v23 = vsub.s32 1, %v278_v20  ;;  %s774_s9 = smov 112  }
  0x19   :  { %686 = vmatprep.subr.bf16.mxu0 %v769_v3  ;;  %705 = vmatprep.subr.bf16.mxu1 %v704_v57 }
  0x1a   :  { %v280_v24 = vrot.slane %v275_v22, %v279_v21 }
  0x1c   :  { %688 = vmatpush3.bf16.msra.mxu0 %v687_v25  ;;  %v284_v25 = vrot.slane %v275_v22, %v283_v23 }
  0x1d   :  { %689 = vmatprep.subr.bf16.mxu0 %v769_v3 }
  0x20   :  { %691 = vmatpush3.bf16.msra.mxu0 %v690_v28 }
  0x23   :  { %635 = vmatmul.mubr.f32.vlgmr.msra.gmra.mrb[0].mxu0 %v907_v29 }
  0x24   :  { %637 = vmatprep.mubr.msk.f32.mxu0 %vm770_vm0, %v771_v6 }
  0x27   :  { %638 = vmatmul.mubr.f32.gmra.mrb[2].mxu0 %v42_v30 }
  0x28   :  { %640 = vmatprep.mubr.msk.f32.mxu0 %vm770_vm0, %v771_v6 }
  0x2b   :  { %641 = vmatmul.mubr.f32.gmra.mrb[4].mxu0 %v43_v31 }
  0xf6   :  { %v133_v42 = vpop.f32.mrb[0].mxu0 }
  0xf7   :  { %v134_v43 = vadd.f32 %v566_v41, %v133_v42  ;;  %v636_v44 = vpop.f32.mrb[1].mxu0 }
  0xf9   :  { %729 = vtanh.f32 %v134_v43 }
  0xfa   :  { %v138_v45 = vpop.f32.mrb[2].mxu0 }
  0xfb   :  { %v139_v46 = vadd.f32 %v566_v41, %v138_v45  ;;  %v639_v47 = vpop.f32.mrb[3].mxu0 }
  0xfd   :  { %731 = vtanh.f32 %v139_v46 }
  0xfe   :  { %v143_v48 = vpop.f32.mrb[4].mxu0 }
  0xff   :  { %v144_v49 = vadd.f32 %v566_v41, %v143_v48  ;;  %v642_v50 = vpop.f32.mrb[5].mxu0 }
 0x101   :  { %733 = vtanh.f32 %v144_v49 }
 0x103   :  { %v730_v51 = vpop.eup %729 }
 0x104   :  { %660 = vmatmul.mubr.msk.f32.vlgmr.msra.gmra.mrb[0].mxu1 %vm165_vm1, %v730_v51 }
 0x105   :  { %662 = vmatprep.mubr.msk.f32.mxu1 %vm770_vm0, %v771_v6  ;;  %707 = vmatpush1.bf16.msra.mxu1 %v706_v61 }
 0x106   :  { %709 = vmatprep.subr.bf16.mxu1 %v708_v62 }
 0x107   :  { %v732_v52 = vpop.eup %731 }
 0x108   :  { %663 = vmatmul.mubr.msk.f32.gmra.mrb[2].mxu1 %vm165_vm1, %v732_v52 }
 0x109   :  { %665 = vmatprep.mubr.msk.f32.mxu1 %vm770_vm0, %v771_v6  ;;  %711 = vmatpush1.bf16.msra.mxu1 %v710_v1 }
 0x10b   :  { %v734_v53 = vpop.eup %733 }
 0x10c   :  { %666 = vmatmul.mubr.msk.f32.gmra.mrb[4].mxu1 %vm165_vm1, %v734_v53 }
 0x10d   :  { %355 = vmatprep.mubr.f32.mxu1 %v771_v6 }
 0x1d7   :  { %v241_v3 = vpop.f32.mrb[0].mxu1 }
 0x1d8   :  { %v975_v4 = vadd.f32 %v567_v2, %v241_v3  ;;  %v661_v5 = vpop.f32.mrb[1].mxu1 }
 0x1da   :  { %v255_v6 = vmul.f32 0.5, %v975_v4  ;;  %v422_v31 = vmul.f32 %v975_v4, %v975_v4  ;;  %v258_v41 = vmul.f32 1.442695, %v975_v4  ;;  %v421_v47 = vadd.f32 1.0, %v975_v4 }
 0x1db   :  { %v246_v7 = vpop.f32.mrb[2].mxu1 }
 0x1dc   :  { %v247_v8 = vadd.f32 %v567_v2, %v246_v7  ;;  %v664_v9 = vpop.f32.mrb[3].mxu1  ;;  %v256_v10 = vmul.f32 1.442695, %v255_v6 }
 0x1de   :  { %735 = vpow2.f32 %v256_v10  ;;  %v464_v52 = vsub.f32 %v975_v4, %v247_v8 }
 0x1df   :  { %v251_v11 = vpop.f32.mrb[4].mxu1 }
 0x1e0   :  { %v252_v12 = vadd.f32 %v567_v2, %v251_v11  ;;  %v667_v13 = vpop.f32.mrb[5].mxu1  ;;  %v465_v53 = vadd.f32 1e-06, %v464_v52 }
 0x1e2   :  { %v507_v40 = vsub.f32 %v975_v4, %v252_v12  ;;  %v466_v54 = vmul.f32 %v465_v53, %v465_v53 }
 0x1e4   :  { %v508_v42 = vadd.f32 1e-06, %v507_v40  ;;  %v467_v55 = vsel %vm453_vm3, %v466_v54, 0.0 }
 0x1e6   :  { %v509_v44 = vmul.f32 %v508_v42, %v508_v42 }
 0x1e8   :  { %v736_v14 = vpop.eup %735 }
 0x1e9   :  { %262 = vrot.lane.b32.xlu0 %v736_v14, %s772_s8 }
 0x25b   :  { %v263_v16 = vpop.permute.xlu0 %262 }
 0x25c   :  { %v265_v17 = vmul.f32 %v263_v16, %v260_v15 }
 0x25e   :  { %v266_v18 = vadd.f32 %v265_v17, %v975_v4 }
 0x260   :  { %571 = vmatmul.mubr.msk.f32.vlgmr.msra.gmra.mrb[6].mxu1 %vm287_vm2, %v266_v18  ;;  %v450_v43 = vsub.f32 %v975_v4, %v266_v18 }
 0x262   :  { %v451_v45 = vadd.f32 1e-06, %v450_v43 }
 0x264   :  { %v452_v49 = vmul.f32 %v451_v45, %v451_v45 }
 0x266   :  { %v454_v56 = vsel %vm453_vm3, %v452_v49, 0.0 }
 0x333   :  { %v357_v26 = vpop.f32.mrb[6].mxu1 }
 0x334   :  { %v987_v27 = vadd.f32 %v357_v26, %v280_v24  ;;  %v359_v28 = vpop.f32.mrb[7].mxu1 }
 0x335   :  { %v989_v30 = vadd.f32 %v359_v28, %v284_v25 }
 0x336   :  { %362 = vmax.xlane.f32.xlu0 %v987_v27 }
 0x337   :  { %391 = vmax.xlane.f32.xlu1 %v989_v30 }
 0x348   :  { %424 = vrot.lane.b32.xlu1 %v422_v31, %s773_s10 }
 0x3c3   :  { %v363_v32 = vpop.xlane.xlu0 %362 }
 0x3c4   :  { %v364_v33 = vsub.f32 %v987_v27, %v363_v32  ;;  %v392_v34 = vpop.xlane.xlu1 %391 }
 0x3c5   :  { %v393_v35 = vsub.f32 %v989_v30, %v392_v34 }
 0x3c6   :  { %v365_v36 = vmul.f32 1.442695, %v364_v33 }
 0x3c7   :  { %v394_v37 = vmul.f32 1.442695, %v393_v35 }
 0x3c8   :  { %737 = vpow2.f32 %v365_v36  ;;  %v425_v46 = vpop.permute.xlu1 %424 }
 0x3c9   :  { %739 = vpow2.f32 %v394_v37  ;;  %v427_v48 = vsub.f32 %v421_v47, %v425_v46 }
 0x3ca   :  { %741 = vpow2.f32 %v258_v41 }
 0x3d2   :  { %v738_v38 = vpop.eup %737 }
 0x3d3   :  { %v740_v39 = vpop.eup %739  ;;  %367 = vadd.xlane.f32.xlu1 %v738_v38 }
 0x3d4   :  { %396 = vadd.xlane.f32.xlu0 %v740_v39  ;;  %v742_v50 = vpop.eup %741 }
 0x3d5   :  { %v428_v51 = vsub.f32 %v427_v48, %v742_v50 }
 0x3e4   :  { %511 = vrot.lane.b32.xlu1 %v509_v44, %s774_s9 }
 0x3ea   :  { %494 = vrot.lane.b32.xlu0 %v452_v49, %s774_s9 }
 0x3ee   :  { %430 = vrot.lane.b32.xlu0 %v428_v51, %s772_s8 }
 0x408   :  { %468 = vadd.xlane.f32.xlu1 %v467_v55 }
 0x40d   :  { %455 = vadd.xlane.f32.xlu0 %v454_v56 }
 0x460   :  { %v368_v57 = vpop.xlane.xlu1 %367 }
 0x461   :  { %743 = vlog2.f32 %v368_v57  ;;  %v397_v58 = vpop.xlane.xlu0 %396 }
 0x462   :  { %745 = vlog2.f32 %v397_v58 }
 0x464   :  { %v512_v61 = vpop.permute.xlu1 %511 }
 0x465   :  { %v495_v59 = vpop.permute.xlu0 %494  ;;  %v514_v63 = vsel %vm453_vm3, %v512_v61, 0.0 }
 0x466   :  { %v497_v60 = vsel %vm453_vm3, %v495_v59, 0.0 }
 0x467   :  { %498 = vadd.xlane.f32.xlu0 %v497_v60 }
 0x469   :  { %v431_v62 = vpop.permute.xlu0 %430 }
 0x46a   :  { %v433_v0 = vsel %vm287_vm2, %v431_v62, 0.0 }
 0x46b   :  { %v744_v1 = vpop.eup %743  ;;  %515 = vadd.xlane.f32.xlu0 %v514_v63  ;;  %434 = vadd.xlane.f32.xlu1 %v433_v0 }
 0x46c   :  { %v746_v2 = vpop.eup %745  ;;  %v370_v3 = vmul.f32 0.6931472, %v744_v1 }
 0x46d   :  { %v399_v4 = vmul.f32 0.6931472, %v746_v2 }
 0x46e   :  { %v371_v5 = vadd.f32 %v370_v3, %v363_v32 }
 0x46f   :  { %v400_v6 = vadd.f32 %v399_v4, %v392_v34 }
 0x470   :  { %v372_v7 = vsub.f32 %v987_v27, %v371_v5 }
 0x471   :  { %v401_v9 = vsub.f32 %v989_v30, %v400_v6 }
 0x472   :  { %v373_v8 = vmul.f32 %v372_v7, %v907_v29 }
 0x473   :  { %v402_v10 = vmul.f32 %v401_v9, %v907_v29 }
 0x474   :  { %374 = vadd.xlane.f32.xlu0 %v373_v8 }
 0x478   :  { %403 = vadd.xlane.f32.xlu0 %v402_v10 }
 0x495   :  { %v469_v12 = vpop.xlane.xlu1 %468 }
 0x496   :  { %vm472_vm6 = vcmp.eq.f32.partialorder %v469_v12, inf  ;;  %v475_v24 = vand.u32 2147483648, %v469_v12  ;;  %vm474_vm8 = vcmp.eq.f32.partialorder %v469_v12, 0.0 }
 0x49a   :  { %v456_v11 = vpop.xlane.xlu0 %455 }
 0x49b   :  { %747 = vrsqrt.f32 %v456_v11  ;;  %vm459_vm4 = vcmp.eq.f32.partialorder %v456_v11, inf  ;;  %v462_v21 = vand.u32 2147483648, %v456_v11  ;;  %vm461_vm7 = vcmp.eq.f32.partialorder %v456_v11, 0.0 }
 0x49c   :  { %749 = vrsqrt.f32 %v469_v12 }
 0x4a5   :  { %v748_v13 = vpop.eup %747 }
 0x4a6   :  { %v750_v14 = vpop.eup %749  ;;  %v458_v15 = vmul.f32 %v748_v13, %v456_v11 }
 0x4a7   :  { %v471_v17 = vmul.f32 %v750_v14, %v469_v12 }
 0x4a8   :  { %v460_v18 = vsel %vm459_vm4, %v456_v11, %v458_v15 }
 0x4a9   :  { %v473_v22 = vsel %vm472_vm6, %v469_v12, %v471_v17  ;;  %v463_v23 = vsel %vm461_vm7, %v462_v21, %v460_v18 }
 0x4aa   :  { %v476_v25 = vsel %vm474_vm8, %v475_v24, %v473_v22 }
 0x4ab   :  { %v477_v26 = vsub.f32 %v463_v23, %v476_v25 }
 0x4ad   :  { %v478_v31 = vadd.f32 1.0, %v477_v26 }
 0x4af   :  { %v479_v37 = vmax.f32 %v478_v31, 0.0 }
 0x4b1   :  { %v480_v45 = vsel %vm376_vm5, %v479_v37, 0.0 }
 0x4f4   :  { %v499_v16 = vpop.xlane.xlu0 %498 }
 0x4f5   :  { %751 = vrsqrt.f32 %v499_v16  ;;  %vm502_vm9 = vcmp.eq.f32.partialorder %v499_v16, inf  ;;  %v505_v38 = vand.u32 2147483648, %v499_v16  ;;  %vm504_vm11 = vcmp.eq.f32.partialorder %v499_v16, 0.0 }
 0x4f8   :  { %v435_v19 = vpop.xlane.xlu1 %434  ;;  %v516_v20 = vpop.xlane.xlu0 %515 }
 0x4f9   :  { %753 = vrsqrt.f32 %v516_v20  ;;  %v436_v29 = vsel %vm376_vm5, %v435_v19, 0.0  ;;  %vm519_vm10 = vcmp.eq.f32.partialorder %v516_v20, inf  ;;  %v522_v39 = vand.u32 2147483648, %v516_v20 }
 0x4fa   :  { %437 = vadd.xlane.f32.xlu0 %v436_v29  ;;  %vm521_vm12 = vcmp.eq.f32.partialorder %v516_v20, 0.0 }
 0x4ff   :  { %v752_v27 = vpop.eup %751 }
 0x500   :  { %v501_v28 = vmul.f32 %v752_v27, %v499_v16 }
 0x501   :  { %v375_v30 = vpop.xlane.xlu0 %374 }
 0x502   :  { %v377_v32 = vsel %vm376_vm5, %v375_v30, 0.0  ;;  %v503_v34 = vsel %vm502_vm9, %v499_v16, %v501_v28 }
 0x503   :  { %v754_v33 = vpop.eup %753  ;;  %378 = vadd.xlane.f32.xlu0 %v377_v32  ;;  %v506_v42 = vsel %vm504_vm11, %v505_v38, %v503_v34 }
 0x504   :  { %v518_v35 = vmul.f32 %v754_v33, %v516_v20 }
 0x505   :  { %v404_v36 = vpop.xlane.xlu0 %403 }
 0x506   :  { %v405_v40 = vsel %vm376_vm5, %v404_v36, 0.0  ;;  %v520_v41 = vsel %vm519_vm10, %v516_v20, %v518_v35 }
 0x507   :  { %406 = vadd.xlane.f32.xlu1 %v405_v40  ;;  %v523_v43 = vsel %vm521_vm12, %v522_v39, %v520_v41 }
 0x508   :  { %v524_v44 = vsub.f32 %v506_v42, %v523_v43 }
 0x50a   :  { %v525_v46 = vadd.f32 1.0, %v524_v44 }
 0x50b   :  { %481 = vadd.xlane.f32.xlu1 %v480_v45 }
 0x50c   :  { %v526_v47 = vmax.f32 %v525_v46, 0.0 }
 0x50e   :  { %v527_v48 = vsel %vm376_vm5, %v526_v47, 0.0 }
 0x50f   :  { %528 = vadd.xlane.f32.xlu0 %v527_v48 }
 0x587   :  { %v438_v49 = vpop.xlane.xlu0 %437 }
 0x588   :  { %v439_v50 = vrot.slane %v438_v49, 4 }
 0x58a   :  { %v440_v51 = vadd.f32 %v439_v50, %v438_v49 }
 0x58c   :  { %v441_v55 = vrot.slane %v440_v51, 2 }
 0x58e   :  { %v442_v62 = vadd.f32 %v441_v55, %v440_v51 }
 0x590   :  { %v379_v52 = vpop.xlane.xlu0 %378  ;;  %v443_v6 = vrot.slane %v442_v62, 1 }
 0x591   :  { %v380_v53 = vrot.slane %v379_v52, 4 }
 0x592   :  { %v444_v13 = vadd.f32 %v443_v6, %v442_v62 }
 0x593   :  { %v381_v54 = vadd.f32 %v380_v53, %v379_v52 }
 0x594   :  { %v407_v56 = vpop.xlane.xlu1 %406 }
 0x595   :  { %v382_v57 = vrot.slane %v381_v54, 2  ;;  %v408_v58 = vrot.slane %v407_v56, 4 }
 0x597   :  { %v409_v59 = vadd.f32 %v408_v58, %v407_v56  ;;  %v383_v60 = vadd.f32 %v382_v57, %v381_v54 }
 0x598   :  { %v482_v61 = vpop.xlane.xlu1 %481 }
 0x599   :  { %v410_v63 = vrot.slane %v409_v59, 2  ;;  %v483_v0 = vrot.slane %v482_v61, 4  ;;  %v384_v1 = vrot.slane %v383_v60, 1 }
 0x59b   :  { %v484_v2 = vadd.f32 %v483_v0, %v482_v61  ;;  %v385_v3 = vadd.f32 %v384_v1, %v383_v60  ;;  %v411_v4 = vadd.f32 %v410_v63, %v409_v59 }
 0x59c   :  { %v529_v5 = vpop.xlane.xlu0 %528 }
 0x59d   :  { %v485_v7 = vrot.slane %v484_v2, 2  ;;  %v530_v8 = vrot.slane %v529_v5, 4  ;;  %712 = vpush %v385_v3  ;;  %v412_v9 = vrot.slane %v411_v4, 1 }
 0x59f   :  { %v486_v10 = vadd.f32 %v485_v7, %v484_v2  ;;  %v531_v11 = vadd.f32 %v530_v8, %v529_v5  ;;  %v413_v12 = vadd.f32 %v412_v9, %v411_v4 }
 0x5a1   :  { %v532_v14 = vrot.slane %v531_v11, 2  ;;  %714 = vpush %v413_v12  ;;  %v487_v15 = vrot.slane %v486_v10, 1 }
 0x5a2   :  { %716 = vpush %v444_v13 }
 0x5a3   :  { %v533_v16 = vadd.f32 %v532_v14, %v531_v11  ;;  %v488_v17 = vadd.f32 %v487_v15, %v486_v10 }
 0x5a5   :  { %718 = vpush %v488_v17  ;;  %v534_v18 = vrot.slane %v533_v16, 1 }
 0x5a7   :  { %v535_v19 = vadd.f32 %v534_v18, %v533_v16 }
 0x5a9   :  { %720 = vpush %v535_v19 }
 0x5ce   :  { %s713_s27 = spop %712 }
 0x5cf   :  { %s389_s28 = smul.f32 0.125, %s713_s27 }
 0x5d1   :  { %s390_s6 = ssub.f32 0.0, %s389_s28 }
 0x5d2   :  { %s715_s29 = spop %714 }
 0x5d3   :  { %s417_s30 = smul.f32 0.125, %s715_s29  ;;  %s717_s5 = spop %716 }
 0x5d4   :  { %s448_s12 = smul.f32 0.125, %s717_s5 }
 0x5d5   :  { %s418_s13 = ssub.f32 0.0, %s417_s30 }
 0x5d6   :  { %s449_s14 = smul.f32 -0.25, %s448_s12  ;;  %s719_s16 = spop %718 }
 0x5d7   :  { %s419_s15 = sadd.f32 %s418_s13, %s390_s6  ;;  %s492_s18 = smul.f32 0.125, %s719_s16 }
 0x5d8   :  { %550 = sst [smem:[#allocation3 + $0x2]] %s449_s14  ;;  %s542_s21 = smul.f32 %s449_s14, %s1019_s0 }
 0x5d9   :  { %s420_s17 = smul.f32 0.5, %s419_s15 }
 0x5da   :  { %s721_s4 = spop %720 }
 0x5db   :  { %548 = sst [smem:[#allocation3 + $0x1]] %s420_s17  ;;  %s539_s19 = smul.f32 0.125, %s721_s4 }
 0x5dc   :  { %s543_s8 = sadd.f32 %s542_s21, %s420_s17 }
 0x5dd   :  { %s540_s22 = sadd.f32 %s539_s19, %s492_s18 }
 0x5df   :  { %s541_s25 = smul.f32 0.5, %s540_s22 }
 0x5e1   :  { %s544_s7 = sadd.f32 %s543_s8, %s541_s25 }
 0x5e3   :  { %546 = sst [smem:[#allocation3]] %s544_s7 }
 0x5e4   :  { %766 = shalt.err (!%p763_p4)
}
 0x5e5   :  { %s775_s26 = smov [#allocation3]  }
 0x5e6   :  { %560 = dma.smem_to_vmem %s775_s26, 16, %s558_s24, [#allocation4]  }
 0x5e7   :  { %767 = dma.done.wait [#allocation4], 16  }
 0x5e8   :  { %768 = vsyncadd [#allocation4], 4294967280 }
 0x5e9   :  { %564 = sfence }
 0x5ea   :  { %565 = vsyncpa [#allocation4], 1 }

</bundles_post_ra>
